<compile_context>
chip_gen: v7x
topology: tpu7x:2x2x1
jax: 0.10.0
libtpu: 0.0.40
codegen_flags: <defaults>
</compile_context>

<pallas_src>
import functools

import jax
import jax.numpy as jnp
from jax.experimental import pallas as pl
from jax.experimental.pallas import tpu as pltpu


def _clip_kernel(x_ref, o_ref, *, lo, hi):
    # lo / hi are Python scalar immediates (or None for a one-sided clamp);
    # weak typing keeps the compute in the input dtype on the VPU.
    x = x_ref[...]
    if lo is not None:
        x = jnp.maximum(x, lo)
    if hi is not None:
        x = jnp.minimum(x, hi)
    o_ref[...] = x


def clip_pallas(x, pixel_min=None, pixel_max=None, *,
                target_block_bytes=2 * 1024 * 1024):
    """Elementwise clamp(x, pixel_min, pixel_max) as a Pallas TPU kernel."""
    if pixel_min is None and pixel_max is None:
        raise ValueError("At least one of pixel_min / pixel_max must not be None.")

    orig_shape = x.shape
    dtype = x.dtype
    itemsize = dtype.itemsize
    # Sublane packing per dtype: 8 rows for 32-bit, 16 for 16-bit, 32 for 8-bit.
    packing = {1: 32, 2: 16}.get(itemsize, 8)
    is_int = jnp.issubdtype(dtype, jnp.integer)

    def _bound(v):
        if v is None:
            return None
        return int(v) if is_int else float(v)

    kernel = functools.partial(_clip_kernel, lo=_bound(pixel_min), hi=_bound(pixel_max))

    n = int(x.size)
    if n == 0:
        return x

    # Pick the widest lane count C (multiple of 128, up to 1024) that divides n.
    C = 0
    for c in range(1024, 0, -128):
        if n % c == 0:
            C = c
            break

    padded = False
    if C == 0:
        # Rare ragged case: element count not a multiple of 128.  Pad the flat
        # vector up to a lane-dense slab and slice back afterwards.
        # TODO(synk): handle the ragged tail with a partial last block instead
        # of pad/slice to avoid the extra HBM passes on this rare path.
        C = 128
        R = pl.cdiv(n, C)
        flat = jnp.pad(x.reshape(-1), (0, R * C - n))
        x2 = flat.reshape(R, C)
        padded = True
    else:
        R = n // C
        x2 = x.reshape(R, C)  # metadata-only reshape of a contiguous array

    # Tile the row (sublane) axis; padded VMEM bytes == logical bytes here
    # because C is a multiple of 128 and tile_r a multiple of the packing.
    row_bytes = C * itemsize
    tile_r = max(packing, (target_block_bytes // row_bytes) // packing * packing)
    if tile_r >= R:
        tile_r = R            # small input: single full-extent block
        nb = 1
    else:
        nb = pl.cdiv(R, tile_r)
        # Rebalance so the nb blocks are roughly even (keeps both v7x TCs busy
        # and avoids a tiny trailing block), while staying packing-aligned.
        even = ((pl.cdiv(R, nb) + packing - 1) // packing) * packing
        tile_r = min(tile_r, even)
        nb = pl.cdiv(R, tile_r)

    out = pl.pallas_call(
        kernel,
        out_shape=jax.ShapeDtypeStruct((R, C), dtype),
        grid_spec=pltpu.PrefetchScalarGridSpec(
            num_scalar_prefetch=0,
            grid=(nb,),
            in_specs=[pl.BlockSpec((tile_r, C), lambda i: (i, 0))],
            out_specs=pl.BlockSpec((tile_r, C), lambda i: (i, 0)),
        ),
        compiler_params=pltpu.CompilerParams(
            dimension_semantics=("parallel",),
        ),
    )(x2)

    if padded:
        return out.reshape(-1)[:n].reshape(orig_shape)
    return out.reshape(orig_shape)


if __name__ == "__main__":
    key = jax.random.PRNGKey(0)

    # 1) NCHW float32, two-sided clamp to [0, 1] (matches the PyTorch module).
    x = jax.random.normal(key, (2, 4, 16, 16), dtype=jnp.float32) * 2.0
    pixel_min, pixel_max = 0.0, 1.0
    y = jax.block_until_ready(clip_pallas(x, pixel_min, pixel_max))
    ref = jnp.clip(x, pixel_min, pixel_max)
    assert y.shape == x.shape and y.dtype == x.dtype
    assert jnp.allclose(y, ref), "mismatch vs reference clamp (f32 two-sided)"

    # 2) One-sided clamp (max only) on a ragged size (exercises the fallback).
    x2 = jax.random.normal(jax.random.PRNGKey(1), (3, 5, 7), dtype=jnp.float32)
    y2 = jax.block_until_ready(clip_pallas(x2, None, 0.5))
    assert jnp.allclose(y2, jnp.minimum(x2, 0.5)), "mismatch (one-sided clamp)"

    # 3) Integer dtype: bounds stay integral, no float promotion.
    x3 = jax.random.randint(jax.random.PRNGKey(2), (4, 96), -10, 10, dtype=jnp.int32)
    y3 = jax.block_until_ready(clip_pallas(x3, 0, 5))
    assert y3.dtype == jnp.int32
    assert jnp.array_equal(y3, jnp.clip(x3, 0, 5)), "mismatch (int32 clamp)"

    print("KERNEL_OK")
</pallas_src>

<mosaic_0001>
module attributes {stable_mosaic.version = 11 : i64} {
  func.func @_clip_kernel(%arg0: i32, %arg1: memref<2x1024xf32, #tpu.memory_space<vmem>>, %arg2: memref<2x1024xf32, #tpu.memory_space<vmem>>) attributes {dimension_semantics = [#tpu.dimension_semantics<parallel>], iteration_bounds = array<i64: 1>, scalar_prefetch = 0 : i64, scratch_operands = 0 : i64, tpu.core_type = #tpu.core_type<tc>, window_params = [{transform_indices = @transform_0, window_bounds = array<i64: 2, 1024>}, {transform_indices = @transform_1, window_bounds = array<i64: 2, 1024>}]} {
    %c0 = arith.constant 0 : index
    %c0_0 = arith.constant 0 : index
    %0 = vector.load %arg1[%c0, %c0_0] : memref<2x1024xf32, #tpu.memory_space<vmem>>, vector<2x1024xf32>
    %cst = arith.constant 0.000000e+00 : f32
    %1 = vector.broadcast %cst : f32 to vector<2x1024xf32>
    %2 = arith.maximumf %0, %1 : vector<2x1024xf32>
    %cst_1 = arith.constant 1.000000e+00 : f32
    %3 = vector.broadcast %cst_1 : f32 to vector<2x1024xf32>
    %4 = arith.minimumf %2, %3 : vector<2x1024xf32>
    %c0_2 = arith.constant 0 : index
    %c0_3 = arith.constant 0 : index
    %5 = vector.load %arg2[%c0_2, %c0_3] : memref<2x1024xf32, #tpu.memory_space<vmem>>, vector<2x1024xf32>
    tpu.vector_store %arg2[%c0_2, %c0_3], %4 {strides = array<i32>} : memref<2x1024xf32, #tpu.memory_space<vmem>>, vector<2x1024xf32>,
    return
  }
  func.func @transform_0(%arg0: i32) -> (i32, i32) {
    %c0_i32 = arith.constant 0 : i32
    %c0_i32_0 = arith.constant 0 : i32
    return %arg0, %c0_i32 : i32, i32
  }
  func.func @transform_1(%arg0: i32) -> (i32, i32) {
    %c0_i32 = arith.constant 0 : i32
    %c0_i32_0 = arith.constant 0 : i32
    return %arg0, %c0_i32 : i32, i32
  }
}

</mosaic_0001>

<bundles_post_ra>
// kernel: tpu_custom_call.1
= control target key start
LH: loop header
LB: loop body
LE: loop exit
PB: predicated region body
PF: predicated region fallthrough
CT: control target
= control target key end

     0   :  { %6 = vsyncpa [#allocation3], 0  ;;  %s130_s0 = inlined_call_operand.hbm [shape: f32[2,1024], index: 0, kind: input, shape index: {}]   ;;  %s131_s1 = inlined_call_operand.hbm [shape: f32[2,1024], index: 1, kind: output, shape index: {}]  }
   0x1   :  { %7 = vsyncpa [#allocation4], 0  ;;  %s94_s6 = smov [#allocation2]   ;;  %s46_s10 = scalar_lea.hbm %s130_s0, 256 }
   0x2   :  { %s14_s7 = sshll.u32 %s94_s6, 4  ;;  %p47_p0 = scmp.ne.s32.totalorder %s130_s0, %s46_s10  ;;  %s15_s7 = int_to_ptr.vmem [resolvable:$true] %s14_s7 }
   0x3   :  { %p50_p1 = scmp.lt.u32.totalorder %s46_s10, %s130_s0 }
   0x5   :  { %p52_p2 = pnand %p50_p1, %p47_p0 }
   0x7   :  { %55 = shalt.err (!%p52_p2)
}
   0x8   :  { %s56_s15 = scalar_lea.vmem %s15_s7, 256  ;;  %p61_p4 = scmp.lt.s32.totalorder %s15_s7, %s15_s7 }
   0x9   :  { %p57_p3 = scmp.ne.s32.totalorder %s15_s7, %s56_s15  ;;  %p62_p5 = scmp.lt.s32.totalorder %s56_s15, %s56_s15 }
   0xb   :  { %p63_p6 = por %p62_p5, %p61_p4 }
   0xd   :  { %p64_p7 = pnand %p63_p6, %p57_p3 }
   0xf   :  { %67 = shalt.err (!%p64_p7)
}
  0x10   :  { %17 = dma.hbm_to_vmem [thread:$0]  %s130_s0, 256, %s15_s7, [#allocation3]  }
  0x11   :  { %90 = dma.done.wait [#allocation3], 256  }
  0x12   :  { %91 = vsyncadd [#allocation3], 4294967040  ;;  %v21_v0 = vld [vmem:[#allocation2] sm:$0xff]  ;;  %v22_v1 = vld [vmem:[#allocation2 + $0x8] sm:$0xff]  ;;  %s95_s18 = smov [#allocation5]  }
  0x13   :  { %s35_s19 = sshll.u32 %s95_s18, 4  ;;  %v23_v2 = vmax.f32 %v21_v0, 0.0  ;;  %v24_v3 = vmax.f32 %v22_v1, 0.0  ;;  %s36_s19 = int_to_ptr.vmem [resolvable:$true] %s35_s19 }
  0x14   :  { %s68_s20 = scalar_lea.vmem %s36_s19, 256  ;;  %p73_p9 = scmp.lt.s32.totalorder %s36_s19, %s36_s19 }
  0x15   :  { %v25_v4 = vmin.f32 %v23_v2, 1.0  ;;  %v26_v5 = vmin.f32 %v24_v3, 1.0  ;;  %p69_p8 = scmp.ne.s32.totalorder %s36_s19, %s68_s20  ;;  %p74_p10 = scmp.lt.s32.totalorder %s68_s20, %s68_s20 }
  0x17   :  { %27 = vst [vmem:[#allocation5] sm:$0xff] %v25_v4  ;;  %28 = vst [vmem:[#allocation5 + $0x8] sm:$0xff] %v26_v5  ;;  %p75_p11 = por %p74_p10, %p73_p9 }
  0x19   :  { %p76_p12 = pnand %p75_p11, %p69_p8 }
  0x1b   :  { %79 = shalt.err (!%p76_p12)
}
  0x1c   :  { %s80_s22 = scalar_lea.hbm %s131_s1, 256 }
  0x1d   :  { %p81_p13 = scmp.ne.s32.totalorder %s131_s1, %s80_s22  ;;  %p84_p0 = scmp.lt.u32.totalorder %s80_s22, %s131_s1 }
  0x1f   :  { %p86_p1 = pnand %p84_p0, %p81_p13 }
  0x21   :  { %89 = shalt.err (!%p86_p1)
}
  0x22   :  { %38 = dma.vmem_to_hbm [thread:$0]  %s36_s19, 256, %s131_s1, [#allocation4]  }
  0x23   :  { %92 = dma.done.wait [#allocation4], 256  }
  0x24   :  { %93 = vsyncadd [#allocation4], 4294967040 }
  0x25   :  { %42 = vsyncpa [#allocation3], 1 }
  0x26   :  { %43 = vsyncpa [#allocation4], 1 }

</bundles_post_ra>
